<compile_context>
chip_gen: v7x
topology: tpu7x:2x2x1
jax: 0.10.0
libtpu: 0.0.40
codegen_flags: <defaults>
</compile_context>

<pallas_src>
import functools

import jax
import jax.numpy as jnp
import numpy as np
from jax.experimental import pallas as pl
from jax.experimental.pallas import tpu as pltpu


def _round_up(x, m):
    return (x + m - 1) // m * m


# ----------------------------------------------------------------------------
# Pallas kernels
# ----------------------------------------------------------------------------
def _conv_bn_relu_kernel(a_ref, w_ref, b_ref, o_ref):
    # a_ref: (tm, K)     bf16 im2col patch tile (streamed over the grid)
    # w_ref: (K, Cout)   bf16 conv weights with folded BN scale (resident)
    # b_ref: (1, Cout)   f32 folded BN bias (resident)
    # o_ref: (tm, Cout)  bf16 activation tile
    acc = jnp.dot(a_ref[...], w_ref[...], preferred_element_type=jnp.float32)
    y = jnp.maximum(acc + b_ref[...], 0.0)
    o_ref[...] = y.astype(o_ref.dtype)


def conv_bn_relu(patches, w_mat, bias, tm=4096):
    """Tiled-over-M matmul + folded-BN bias + ReLU.  bf16 in, bf16 out."""
    M, K = patches.shape
    _, Cout = w_mat.shape
    # Biggest sensible tile; keep it a multiple of 8 (sublane friendly).
    tm = min(tm, _round_up(M, 256))
    tm = max(8, tm - tm % 8)
    M_pad = _round_up(M, tm)
    if M_pad != M:
        patches = jnp.pad(patches, ((0, M_pad - M), (0, 0)))

    flops = 2 * M_pad * K * Cout
    bytes_accessed = (M_pad * K * 2 + K * Cout * 2 + Cout * 4
                      + M_pad * Cout * 2)

    out = pl.pallas_call(
        _conv_bn_relu_kernel,
        out_shape=jax.ShapeDtypeStruct((M_pad, Cout), jnp.bfloat16),
        grid=(M_pad // tm,),
        in_specs=[
            pl.BlockSpec((tm, K), lambda i: (i, 0)),    # streamed patches
            pl.BlockSpec((K, Cout), lambda i: (0, 0)),  # resident weights
            pl.BlockSpec((1, Cout), lambda i: (0, 0)),  # resident bias
        ],
        out_specs=pl.BlockSpec((tm, Cout), lambda i: (i, 0)),
        compiler_params=pltpu.CompilerParams(
            dimension_semantics=("parallel",),
            vmem_limit_bytes=32 * 1024 * 1024),
        cost_estimate=pl.CostEstimate(
            flops=flops, transcendentals=0, bytes_accessed=bytes_accessed),
    )(patches, w_mat, bias)
    return out[:M] if M_pad != M else out


def _maxpool3x3s2_kernel(y_ref, o_ref, yp_ref, *, oh, ow, ph, pw):
    # y_ref:  (OH, OW, C)       bf16 post-ReLU conv activation for one image
    # o_ref:  (PH, PW, C)       bf16 pooled output
    # yp_ref: (OH+1, OW+1, C)   f32 VMEM scratch, zero top/left border
    #
    # Zero padding is exact here: y >= 0 after ReLU, so 0 behaves like -inf
    # for the max, and with OH, OW even the 3x3/s2 windows never overrun the
    # bottom/right edges, so only a 1-element top/left border is needed.
    yp_ref[...] = jnp.zeros_like(yp_ref)
    yp_ref[1:oh + 1, 1:ow + 1, :] = y_ref[...].astype(yp_ref.dtype)

    m = yp_ref[pl.ds(0, ph, stride=2), pl.ds(0, pw, stride=2), :]
    for i in range(3):
        for j in range(3):
            if i == 0 and j == 0:
                continue
            m = jnp.maximum(
                m, yp_ref[pl.ds(i, ph, stride=2), pl.ds(j, pw, stride=2), :])
    o_ref[...] = m.astype(o_ref.dtype)


def maxpool3x3s2(y_nhwc):
    """3x3 / stride-2 / pad-1 max pool, borders handled in-kernel (no HBM pad).

    y_nhwc: (N, OH, OW, C) bf16, OH and OW even.
    """
    N, OH, OW, C = y_nhwc.shape
    PH, PW = OH // 2, OW // 2
    kernel = functools.partial(_maxpool3x3s2_kernel, oh=OH, ow=OW, ph=PH, pw=PW)
    bytes_accessed = N * (OH * OW + PH * PW) * C * 2
    # TODO(synk): for v7x with N < 2, re-grid as (N, PH // tr) so both
    #             TensorCores are busy and blocks shrink under 64 MiB VMEM.
    return pl.pallas_call(
        kernel,
        out_shape=jax.ShapeDtypeStruct((N, PH, PW, C), jnp.bfloat16),
        grid=(N,),
        in_specs=[pl.BlockSpec((None, OH, OW, C), lambda n: (n, 0, 0, 0))],
        out_specs=pl.BlockSpec((None, PH, PW, C), lambda n: (n, 0, 0, 0)),
        scratch_shapes=[pltpu.VMEM((OH + 1, OW + 1, C), jnp.float32)],
        compiler_params=pltpu.CompilerParams(
            dimension_semantics=("parallel",),
            vmem_limit_bytes=32 * 1024 * 1024),
        cost_estimate=pl.CostEstimate(
            flops=9 * N * PH * PW * C, transcendentals=0,
            bytes_accessed=bytes_accessed),
    )(y_nhwc)


# ----------------------------------------------------------------------------
# JAX glue (layout plumbing: im2col / weight folding / flatten ordering)
# ----------------------------------------------------------------------------
def _im2col(x_nhwc, kh, kw, stride, pad):
    N, H, W, C = x_nhwc.shape
    OH = (H + 2 * pad - kh) // stride + 1
    OW = (W + 2 * pad - kw) // stride + 1
    xp = jnp.pad(x_nhwc, ((0, 0), (pad, pad), (pad, pad), (0, 0)))
    cols = []
    for i in range(kh):
        for j in range(kw):
            cols.append(xp[:, i:i + stride * OH:stride,
                           j:j + stride * OW:stride, :])
    patches = jnp.stack(cols, axis=3)  # (N, OH, OW, kh*kw, C)
    return patches.reshape(N * OH * OW, kh * kw * C), (N, OH, OW)


def wsl_forward(x_nchw, params, conv_tm=4096):
    w, gamma, beta, run_mean, run_var = params
    eps = 1e-5
    N, Cin, H, W = x_nchw.shape
    # TODO(synk): general H, W needs bottom/right pool padding; the stem here
    #             assumes H, W divisible by 4 (true for 224x224 ImageNet crops).
    assert H % 4 == 0 and W % 4 == 0, "stem assumes H, W divisible by 4"
    Cout = w.shape[0]

    # NCHW -> NHWC (channels = lane dim); bf16 activations feed the MXU and
    # halve the im2col HBM traffic.
    x = jnp.transpose(x_nchw, (0, 2, 3, 1)).astype(jnp.bfloat16)

    # Fold BN (eval mode): scale into the weights; bias stays f32 in the
    # kernel epilogue.
    scale = gamma / jnp.sqrt(run_var + eps)
    bias = (beta - run_mean * scale).astype(jnp.float32).reshape(1, Cout)

    # --- Conv 7x7 s2 p3 + BN + ReLU, as tiled im2col matmul in Pallas ---
    patches, (N_, OH, OW) = _im2col(x, 7, 7, stride=2, pad=3)
    # weight (Cout, Cin, kh, kw) -> (kh, kw, Cin, Cout) -> (kh*kw*Cin, Cout)
    w_mat = jnp.transpose(w, (2, 3, 1, 0)).reshape(7 * 7 * Cin, Cout)
    w_mat = (w_mat * scale[None, :]).astype(jnp.bfloat16)
    y = conv_bn_relu(patches, w_mat, bias, tm=conv_tm)      # (M, Cout) bf16
    y = y.reshape(N, OH, OW, Cout)

    # --- MaxPool 3x3 s2 p1, borders handled in-kernel (no -inf HBM pad) ---
    z = maxpool3x3s2(y)                                      # (N, PH, PW, Cout)

    # --- torch.flatten(x, start_dim=1) on NCHW: channels outermost ---
    z_nchw = jnp.transpose(z, (0, 3, 1, 2)).astype(jnp.float32)
    return z_nchw.reshape(N, -1)


# ----------------------------------------------------------------------------
# Pure-JAX reference (sanity check only; f32 end to end)
# ----------------------------------------------------------------------------
def wsl_reference(x_nchw, params):
    w, gamma, beta, run_mean, run_var = params
    eps = 1e-5
    x = jnp.transpose(x_nchw, (0, 2, 3, 1)).astype(jnp.float32)
    w_hwio = jnp.transpose(w, (2, 3, 1, 0))
    y = jax.lax.conv_general_dilated(
        x, w_hwio, window_strides=(2, 2), padding=[(3, 3), (3, 3)],
        dimension_numbers=("NHWC", "HWIO", "NHWC"))
    scale = gamma / jnp.sqrt(run_var + eps)
    bias = beta - run_mean * scale
    y = jnp.maximum(y * scale + bias, 0.0)
    z = jax.lax.reduce_window(
        y, -jnp.inf, jax.lax.max, (1, 3, 3, 1), (1, 2, 2, 1),
        [(0, 0), (1, 1), (1, 1), (0, 0)])
    z_nchw = jnp.transpose(z, (0, 3, 1, 2))
    return z_nchw.reshape(z.shape[0], -1)


# ----------------------------------------------------------------------------
# Main
# ----------------------------------------------------------------------------
if __name__ == "__main__":
    key = jax.random.PRNGKey(0)
    k_x, k_w, k_g, k_b, k_m, k_v = jax.random.split(key, 6)

    N, Cin, H, W = 2, 3, 16, 16
    Cout = 64

    x = jax.random.normal(k_x, (N, Cin, H, W), dtype=jnp.float32)

    conv_w = jax.random.normal(k_w, (Cout, Cin, 7, 7), dtype=jnp.float32) * 0.05
    bn_gamma = 1.0 + 0.1 * jax.random.normal(k_g, (Cout,), dtype=jnp.float32)
    bn_beta = 0.1 * jax.random.normal(k_b, (Cout,), dtype=jnp.float32)
    bn_mean = 0.1 * jax.random.normal(k_m, (Cout,), dtype=jnp.float32)
    bn_var = jnp.abs(jax.random.normal(k_v, (Cout,), dtype=jnp.float32)) + 0.5

    params = (conv_w, bn_gamma, bn_beta, bn_mean, bn_var)

    # conv_tm=64 so the tiny test exercises a multi-step (pipelined) grid;
    # real inputs use the default tm=4096.
    fwd = jax.jit(functools.partial(wsl_forward, conv_tm=64))
    out = jax.block_until_ready(fwd(x, params))

    ref = wsl_reference(x, params)
    assert out.shape == (N, Cout * 4 * 4), out.shape
    # Tolerance accounts for bf16 MXU operands / bf16 activations vs f32 ref.
    np.testing.assert_allclose(np.asarray(out), np.asarray(ref),
                               rtol=5e-2, atol=5e-2)

    print("KERNEL_OK")
</pallas_src>

<mosaic_0001>
module attributes {stable_mosaic.version = 11 : i64} {
  func.func @_conv_bn_relu_kernel(%arg0: i32, %arg1: memref<64x147xbf16, #tpu.memory_space<vmem>>, %arg2: memref<147x64xbf16, #tpu.memory_space<vmem>>, %arg3: memref<1x64xf32, #tpu.memory_space<vmem>>, %arg4: memref<64x64xbf16, #tpu.memory_space<vmem>>) attributes {dimension_semantics = [#tpu.dimension_semantics<parallel>], iteration_bounds = array<i64: 2>, scalar_prefetch = 0 : i64, scratch_operands = 0 : i64, tpu.core_type = #tpu.core_type<tc>, window_params = [{transform_indices = @transform_0, window_bounds = array<i64: 64, 147>}, {pipeline_mode = #tpu.pipeline_mode<synchronous>, transform_indices = @transform_1, window_bounds = array<i64: 147, 64>}, {pipeline_mode = #tpu.pipeline_mode<synchronous>, transform_indices = @transform_2, window_bounds = array<i64: 1, 64>}, {transform_indices = @transform_3, window_bounds = array<i64: 64, 64>}]} {
    %c0 = arith.constant 0 : index
    %c0_0 = arith.constant 0 : index
    %0 = vector.load %arg1[%c0, %c0_0] : memref<64x147xbf16, #tpu.memory_space<vmem>>, vector<64x147xbf16>
    %c0_1 = arith.constant 0 : index
    %c0_2 = arith.constant 0 : index
    %1 = vector.load %arg2[%c0_1, %c0_2] : memref<147x64xbf16, #tpu.memory_space<vmem>>, vector<147x64xbf16>
    %cst = arith.constant dense<0.000000e+00> : vector<64x64xf32>
    %2 = tpu.matmul %0, %1, %cst {dimension_numbers = #tpu.dot_dimension_numbers<[1], [0], [0], [1], [0, 0, 1, 1], [], []>} : vector<64x147xbf16>, vector<147x64xbf16>, vector<64x64xf32> -> vector<64x64xf32>
    %c0_3 = arith.constant 0 : index
    %c0_4 = arith.constant 0 : index
    %3 = vector.load %arg3[%c0_3, %c0_4] : memref<1x64xf32, #tpu.memory_space<vmem>>, vector<1x64xf32>
    %4 = vector.broadcast %3 : vector<1x64xf32> to vector<64x64xf32>
    %5 = arith.addf %2, %4 : vector<64x64xf32>
    %cst_5 = arith.constant 0.000000e+00 : f32
    %6 = vector.broadcast %cst_5 : f32 to vector<64x64xf32>
    %7 = arith.maximumf %5, %6 : vector<64x64xf32>
    %8 = arith.truncf %7 : vector<64x64xf32> to vector<64x64xbf16>
    %c0_6 = arith.constant 0 : index
    %c0_7 = arith.constant 0 : index
    %9 = vector.load %arg4[%c0_6, %c0_7] : memref<64x64xbf16, #tpu.memory_space<vmem>>, vector<64x64xbf16>
    tpu.vector_store %arg4[%c0_6, %c0_7], %8 {strides = array<i32>} : memref<64x64xbf16, #tpu.memory_space<vmem>>, vector<64x64xbf16>,
    return
  }
  func.func @transform_0(%arg0: i32) -> (i32, i32) {
    %c0_i32 = arith.constant 0 : i32
    %c0_i32_0 = arith.constant 0 : i32
    return %arg0, %c0_i32 : i32, i32
  }
  func.func @transform_1(%arg0: i32) -> (i32, i32) {
    %c0_i32 = arith.constant 0 : i32
    %c0_i32_0 = arith.constant 0 : i32
    %c0_i32_1 = arith.constant 0 : i32
    return %c0_i32, %c0_i32_0 : i32, i32
  }
  func.func @transform_2(%arg0: i32) -> (i32, i32) {
    %c0_i32 = arith.constant 0 : i32
    %c0_i32_0 = arith.constant 0 : i32
    %c0_i32_1 = arith.constant 0 : i32
    return %c0_i32, %c0_i32_0 : i32, i32
  }
  func.func @transform_3(%arg0: i32) -> (i32, i32) {
    %c0_i32 = arith.constant 0 : i32
    %c0_i32_0 = arith.constant 0 : i32
    return %arg0, %c0_i32 : i32, i32
  }
}

module attributes {stable_mosaic.version = 11 : i64} {
  func.func @_maxpool3x3s2_kernel(%arg0: i32, %arg1: memref<1x8x8x64xbf16, #tpu.memory_space<vmem>>, %arg2: memref<1x4x4x64xbf16, #tpu.memory_space<vmem>>, %arg3: memref<9x9x64xf32, #tpu.memory_space<vmem>>) attributes {dimension_semantics = [#tpu.dimension_semantics<parallel>], iteration_bounds = array<i64: 2>, scalar_prefetch = 0 : i64, scratch_operands = 1 : i64, tpu.core_type = #tpu.core_type<tc>, window_params = [{transform_indices = @transform_0, window_bounds = array<i64: 1, 8, 8, 64>}, {transform_indices = @transform_1, window_bounds = array<i64: 1, 4, 4, 64>}]} {
    %cst = arith.constant 0.000000e+00 : f32
    %0 = vector.broadcast %cst : f32 to vector<9x9x64xf32>
    %c0 = arith.constant 0 : index
    %c0_0 = arith.constant 0 : index
    %c0_1 = arith.constant 0 : index
    %1 = vector.load %arg3[%c0, %c0_0, %c0_1] : memref<9x9x64xf32, #tpu.memory_space<vmem>>, vector<9x9x64xf32>
    tpu.vector_store %arg3[%c0, %c0_0, %c0_1], %0 {strides = array<i32>} : memref<9x9x64xf32, #tpu.memory_space<vmem>>, vector<9x9x64xf32>,
    %c0_2 = arith.constant 0 : index
    %c0_3 = arith.constant 0 : index
    %c0_4 = arith.constant 0 : index
    %c0_5 = arith.constant 0 : index
    %2 = vector.load %arg1[%c0_2, %c0_3, %c0_4, %c0_5] : memref<1x8x8x64xbf16, #tpu.memory_space<vmem>>, vector<1x8x8x64xbf16>
    %3 = vector.shape_cast %2 : vector<1x8x8x64xbf16> to vector<8x8x64xbf16>
    %4 = arith.extf %3 : vector<8x8x64xbf16> to vector<8x8x64xf32>
    %c1 = arith.constant 1 : index
    %c1_6 = arith.constant 1 : index
    %c0_7 = arith.constant 0 : index
    %5 = vector.load %arg3[%c1, %c1_6, %c0_7] : memref<9x9x64xf32, #tpu.memory_space<vmem>>, vector<8x8x64xf32>
    tpu.vector_store %arg3[%c1, %c1_6, %c0_7], %4 {strides = array<i32>} : memref<9x9x64xf32, #tpu.memory_space<vmem>>, vector<8x8x64xf32>,
    %c0_8 = arith.constant 0 : index
    %c0_9 = arith.constant 0 : index
    %c0_10 = arith.constant 0 : index
    %6 = tpu.strided_load %arg3[%c0_8, %c0_9, %c0_10] {strides = array<i32: 2, 2, 1>} : memref<9x9x64xf32, #tpu.memory_space<vmem>>, vector<4x4x64xf32>
    %c0_11 = arith.constant 0 : index
    %c1_12 = arith.constant 1 : index
    %c0_13 = arith.constant 0 : index
    %7 = tpu.strided_load %arg3[%c0_11, %c1_12, %c0_13] {strides = array<i32: 2, 2, 1>} : memref<9x9x64xf32, #tpu.memory_space<vmem>>, vector<4x4x64xf32>
    %8 = arith.maximumf %6, %7 : vector<4x4x64xf32>
    %c0_14 = arith.constant 0 : index
    %c2 = arith.constant 2 : index
    %c0_15 = arith.constant 0 : index
    %9 = tpu.strided_load %arg3[%c0_14, %c2, %c0_15] {strides = array<i32: 2, 2, 1>} : memref<9x9x64xf32, #tpu.memory_space<vmem>>, vector<4x4x64xf32>
    %10 = arith.maximumf %8, %9 : vector<4x4x64xf32>
    %c1_16 = arith.constant 1 : index
    %c0_17 = arith.constant 0 : index
    %c0_18 = arith.constant 0 : index
    %11 = tpu.strided_load %arg3[%c1_16, %c0_17, %c0_18] {strides = array<i32: 2, 2, 1>} : memref<9x9x64xf32, #tpu.memory_space<vmem>>, vector<4x4x64xf32>
    %12 = arith.maximumf %10, %11 : vector<4x4x64xf32>
    %c1_19 = arith.constant 1 : index
    %c1_20 = arith.constant 1 : index
    %c0_21 = arith.constant 0 : index
    %13 = tpu.strided_load %arg3[%c1_19, %c1_20, %c0_21] {strides = array<i32: 2, 2, 1>} : memref<9x9x64xf32, #tpu.memory_space<vmem>>, vector<4x4x64xf32>
    %14 = arith.maximumf %12, %13 : vector<4x4x64xf32>
    %c1_22 = arith.constant 1 : index
    %c2_23 = arith.constant 2 : index
    %c0_24 = arith.constant 0 : index
    %15 = tpu.strided_load %arg3[%c1_22, %c2_23, %c0_24] {strides = array<i32: 2, 2, 1>} : memref<9x9x64xf32, #tpu.memory_space<vmem>>, vector<4x4x64xf32>
    %16 = arith.maximumf %14, %15 : vector<4x4x64xf32>
    %c2_25 = arith.constant 2 : index
    %c0_26 = arith.constant 0 : index
    %c0_27 = arith.constant 0 : index
    %17 = tpu.strided_load %arg3[%c2_25, %c0_26, %c0_27] {strides = array<i32: 2, 2, 1>} : memref<9x9x64xf32, #tpu.memory_space<vmem>>, vector<4x4x64xf32>
    %18 = arith.maximumf %16, %17 : vector<4x4x64xf32>
    %c2_28 = arith.constant 2 : index
    %c1_29 = arith.constant 1 : index
    %c0_30 = arith.constant 0 : index
    %19 = tpu.strided_load %arg3[%c2_28, %c1_29, %c0_30] {strides = array<i32: 2, 2, 1>} : memref<9x9x64xf32, #tpu.memory_space<vmem>>, vector<4x4x64xf32>
    %20 = arith.maximumf %18, %19 : vector<4x4x64xf32>
    %c2_31 = arith.constant 2 : index
    %c2_32 = arith.constant 2 : index
    %c0_33 = arith.constant 0 : index
    %21 = tpu.strided_load %arg3[%c2_31, %c2_32, %c0_33] {strides = array<i32: 2, 2, 1>} : memref<9x9x64xf32, #tpu.memory_space<vmem>>, vector<4x4x64xf32>
    %22 = arith.maximumf %20, %21 : vector<4x4x64xf32>
    %23 = arith.truncf %22 : vector<4x4x64xf32> to vector<4x4x64xbf16>
    %c0_34 = arith.constant 0 : index
    %c0_35 = arith.constant 0 : index
    %c0_36 = arith.constant 0 : index
    %c0_37 = arith.constant 0 : index
    %24 = vector.load %arg2[%c0_34, %c0_35, %c0_36, %c0_37] : memref<1x4x4x64xbf16, #tpu.memory_space<vmem>>, vector<1x4x4x64xbf16>
    %25 = vector.shape_cast %24 : vector<1x4x4x64xbf16> to vector<4x4x64xbf16>
    %26 = vector.shape_cast %23 : vector<4x4x64xbf16> to vector<1x4x4x64xbf16>
    tpu.vector_store %arg2[%c0_34, %c0_35, %c0_36, %c0_37], %26 {strides = array<i32>} : memref<1x4x4x64xbf16, #tpu.memory_space<vmem>>, vector<1x4x4x64xbf16>,
    return
  }
  func.func @transform_0(%arg0: i32) -> (i32, i32, i32, i32) {
    %c0_i32 = arith.constant 0 : i32
    %c0_i32_0 = arith.constant 0 : i32
    %c0_i32_1 = arith.constant 0 : i32
    %c0_i32_2 = arith.constant 0 : i32
    return %arg0, %c0_i32, %c0_i32_0, %c0_i32_1 : i32, i32, i32, i32
  }
  func.func @transform_1(%arg0: i32) -> (i32, i32, i32, i32) {
    %c0_i32 = arith.constant 0 : i32
    %c0_i32_0 = arith.constant 0 : i32
    %c0_i32_1 = arith.constant 0 : i32
    %c0_i32_2 = arith.constant 0 : i32
    return %arg0, %c0_i32, %c0_i32_0, %c0_i32_1 : i32, i32, i32, i32
  }
}

</mosaic_0001>

<bundles_post_ra>
// kernel: wsl_forward.3
= control target key start
LH: loop header
LB: loop body
LE: loop exit
PB: predicated region body
PF: predicated region fallthrough
CT: control target
= control target key end

     0   :  { %s410_s6 = smov 0   ;;  %s473_s0 = inlined_call_operand.vmem [shape: bf16[2,8,8,64], index: 0, kind: input, shape index: {}]   ;;  %s474_s1 = inlined_call_operand.vmem [shape: bf16[2,4,4,64], index: 1, kind: output, shape index: {}]  }
   0x1 LB: > { %s350_s7 = sadd.s32 4294967295, %s397_s6   ;;  %p354_p0 = scmp.ge.s32.totalorder %s397_s6, 1  ;;  %s397_s6 = sphi %s410_s6, %s11_s6  }
   0x2   : > { %p87_p1 = scmp.lt.s32.totalorder %s397_s6, 3 }
   0x4   : > { %p88_p2 = pnand %p354_p0, %p87_p1 }
   0x5   : > { %vm117_vm0 = vcmask (!%p88_p2), 523264   ;;  %vm119_vm1 = vcmask (!%p88_p2), 516096   ;;  %p418_p3 = scmp.lt.s32.totalorder (!%p88_p2), %s350_s7, 1  ;;  %v399_v0 = vmov (!%p88_p2), 0.0   ;;  %vm268_vm2 = vcmask (!%p88_p2), 517120  }
   0x6   : > { %91 = sbr.rel (%p88_p2) target bundleno = 54 (0x36), region = 24  ;;  %118 = vst.msk [vmem:[#allocation2] sm:$0xff] (!%p88_p2), %vm117_vm0, %v399_v0  ;;  %121 = vst.msk [vmem:[#allocation2 + $0x10] sm:$0xff] (!%p88_p2), %vm117_vm0, %v399_v0 }
   0x7   : > { %123 = vst.msk [vmem:[#allocation2 + $0x20] sm:$0xff] (!%p88_p2), %vm117_vm0, %v399_v0  ;;  %125 = vst.msk [vmem:[#allocation2 + $0x30] sm:$0xff] (!%p88_p2), %vm117_vm0, %v399_v0 }
   0x8   : > { %127 = vst.msk [vmem:[#allocation2 + $0x40] sm:$0xff] (!%p88_p2), %vm117_vm0, %v399_v0  ;;  %129 = vst.msk [vmem:[#allocation2 + $0x50] sm:$0xff] (!%p88_p2), %vm117_vm0, %v399_v0 }
   0x9   : > { %131 = vst.msk [vmem:[#allocation2 + $0x60] sm:$0xff] (!%p88_p2), %vm117_vm0, %v399_v0  ;;  %133 = vst.msk [vmem:[#allocation2 + $0x70] sm:$0xff] (!%p88_p2), %vm117_vm0, %v399_v0 }
   0xa   : > { %135 = vst.msk [vmem:[#allocation2 + $0x80] sm:$0xff] (!%p88_p2), %vm117_vm0, %v399_v0 }
   0xb   : > { %120 = vst.msk [vmem:[#allocation2 + $0x8] sm:$0x1] (!%p88_p2), %vm119_vm1, %v399_v0  ;;  %122 = vst.msk [vmem:[#allocation2 + $0x18] sm:$0x1] (!%p88_p2), %vm119_vm1, %v399_v0 }
   0xc   : > { %124 = vst.msk [vmem:[#allocation2 + $0x28] sm:$0x1] (!%p88_p2), %vm119_vm1, %v399_v0  ;;  %126 = vst.msk [vmem:[#allocation2 + $0x38] sm:$0x1] (!%p88_p2), %vm119_vm1, %v399_v0 }
   0xd   : > { %128 = vst.msk [vmem:[#allocation2 + $0x48] sm:$0x1] %vm119_vm1, %v399_v0  ;;  %130 = vst.msk [vmem:[#allocation2 + $0x58] sm:$0x1] %vm119_vm1, %v399_v0  ;;  %s477_s7 = smov (!%p418_p3, %s350_s7), 1 }
   0xe   : > { %132 = vst.msk [vmem:[#allocation2 + $0x68] sm:$0x1] %vm119_vm1, %v399_v0  ;;  %134 = vst.msk [vmem:[#allocation2 + $0x78] sm:$0x1] %vm119_vm1, %v399_v0  ;;  %s361_s9 = sshll.u32 %s477_s7, 5  ;;  %s362_s13 = sshll.u32 %s477_s7, 3 }
   0xf   : > { %136 = vst.msk [vmem:[#allocation2 + $0x88] sm:$0x1] %vm119_vm1, %v399_v0  ;;  %s111_s12 = scalar_lea.vmem %s473_s0, %s361_s9  ;;  %v162_v13 = vld [vmem:[#allocation2] ss:$2 sm:$0xf]  ;;  %s460_s16 = scalar_lea.vmem %s474_s1, %s362_s13 }
  0x10   : > { %v364_v1 = vld [vmem:[%s111_s12] sm:$0xff]   ;;  %v379_v2 = vld [vmem:[%s111_s12 + $0x8] sm:$0xff]   ;;  %v380_v3 = vld [vmem:[%s111_s12 + $0x10] sm:$0xff]  }
  0x11   : > { %v365_v4 = vunpack.c.l.bf16 %v364_v1  ;;  %v366_v5 = vunpack.c.h.bf16 %v364_v1  ;;  %v370_v6 = vunpack.c.h.bf16 %v379_v2  ;;  %v374_v7 = vunpack.c.h.bf16 %v380_v3  ;;  %v381_v8 = vld [vmem:[%s111_s12 + $0x18] sm:$0xff]   ;;  %v170_v14 = vld [vmem:[#allocation2 + $0x1] ss:$2 sm:$0xf] }
  0x12   : > { %v369_v9 = vunpack.c.l.bf16 %v379_v2  ;;  %v373_v10 = vunpack.c.l.bf16 %v380_v3  ;;  %v377_v11 = vunpack.c.l.bf16 %v381_v8  ;;  %v378_v12 = vunpack.c.h.bf16 %v381_v8  ;;  %v182_v16 = vld [vmem:[#allocation2 + $0x2] ss:$2 sm:$0xf] }
  0x13   : > { %154 = vst.msk [vmem:[#allocation2 + $0x11] sm:$0xff] %vm117_vm0, %v365_v4  ;;  %155 = vst.msk [vmem:[#allocation2 + $0x21] sm:$0xff] %vm117_vm0, %v366_v5  ;;  %v177_v15 = vmax.f32 %v162_v13, %v170_v14 }
  0x14   : > { %157 = vst.msk [vmem:[#allocation2 + $0x41] sm:$0xff] %vm117_vm0, %v370_v6  ;;  %159 = vst.msk [vmem:[#allocation2 + $0x61] sm:$0xff] %vm117_vm0, %v374_v7 }
  0x15   : > { %156 = vst.msk [vmem:[#allocation2 + $0x31] sm:$0xff] %vm117_vm0, %v369_v9  ;;  %158 = vst.msk [vmem:[#allocation2 + $0x51] sm:$0xff] %vm117_vm0, %v373_v10  ;;  %v189_v17 = vmax.f32 %v177_v15, %v182_v16 }
  0x16   : > { %160 = vst.msk [vmem:[#allocation2 + $0x71] sm:$0xff] %vm117_vm0, %v377_v11  ;;  %161 = vst.msk [vmem:[#allocation2 + $0x81] sm:$0xff] %vm117_vm0, %v378_v12 }
  0x1a   : > { %v193_v18 = vld [vmem:[#allocation2 + $0x10] ss:$2 sm:$0xf]  ;;  %v205_v19 = vld [vmem:[#allocation2 + $0x11] ss:$2 sm:$0xf] }
  0x1b   : > { %v200_v20 = vmax.f32 %v189_v17, %v193_v18  ;;  %v217_v21 = vld [vmem:[#allocation2 + $0x12] ss:$2 sm:$0xf]  ;;  %v164_v23 = vld [vmem:[#allocation2 + $0x20] ss:$2 sm:$0xf] }
  0x1c   : > { %v172_v24 = vld [vmem:[#allocation2 + $0x21] ss:$2 sm:$0xf]  ;;  %v184_v27 = vld [vmem:[#allocation2 + $0x22] ss:$2 sm:$0xf] }
  0x1d   : > { %v212_v22 = vmax.f32 %v200_v20, %v205_v19  ;;  %v178_v25 = vmax.f32 %v164_v23, %v172_v24  ;;  %v195_v28 = vld [vmem:[#allocation2 + $0x30] ss:$2 sm:$0xf]  ;;  %v229_v29 = vld [vmem:[#allocation2 + $0x20] ss:$2 sm:$0xf] }
  0x1e   : > { %v166_v32 = vld [vmem:[#allocation2 + $0x40] ss:$2 sm:$0xf]  ;;  %v241_v33 = vld [vmem:[#allocation2 + $0x21] ss:$2 sm:$0xf] }
  0x1f   : > { %v224_v26 = vmax.f32 %v212_v22, %v217_v21  ;;  %v190_v30 = vmax.f32 %v178_v25, %v184_v27  ;;  %v174_v35 = vld [vmem:[#allocation2 + $0x41] ss:$2 sm:$0xf]  ;;  %v253_v37 = vld [vmem:[#allocation2 + $0x22] ss:$2 sm:$0xf] }
  0x20   : > { %v207_v38 = vld [vmem:[#allocation2 + $0x31] ss:$2 sm:$0xf]  ;;  %v179_v39 = vmax.f32 %v166_v32, %v174_v35  ;;  %v186_v41 = vld [vmem:[#allocation2 + $0x42] ss:$2 sm:$0xf] }
  0x21   : > { %v236_v31 = vmax.f32 %v224_v26, %v229_v29  ;;  %v201_v34 = vmax.f32 %v190_v30, %v195_v28  ;;  %v197_v42 = vld [vmem:[#allocation2 + $0x50] ss:$2 sm:$0xf]  ;;  %v168_v47 = vld [vmem:[#allocation2 + $0x60] ss:$2 sm:$0xf] }
  0x22   : > { %v219_v44 = vld [vmem:[#allocation2 + $0x32] ss:$2 sm:$0xf]  ;;  %v191_v45 = vmax.f32 %v179_v39, %v186_v41  ;;  %v176_v48 = vld [vmem:[#allocation2 + $0x61] ss:$2 sm:$0xf] }
  0x23   : > { %v248_v36 = vmax.f32 %v236_v31, %v241_v33  ;;  %v213_v40 = vmax.f32 %v201_v34, %v207_v38  ;;  %v231_v50 = vld [vmem:[#allocation2 + $0x40] ss:$2 sm:$0xf]  ;;  %v209_v52 = vld [vmem:[#allocation2 + $0x51] ss:$2 sm:$0xf]  ;;  %v180_v53 = vmax.f32 %v168_v47, %v176_v48 }
  0x24   : > { %v202_v51 = vmax.f32 %v191_v45, %v197_v42  ;;  %v188_v55 = vld [vmem:[#allocation2 + $0x62] ss:$2 sm:$0xf]  ;;  %v199_v56 = vld [vmem:[#allocation2 + $0x70] ss:$2 sm:$0xf] }
  0x25   : > { %v260_v43 = vmax.f32 %v248_v36, %v253_v37  ;;  %v225_v46 = vmax.f32 %v213_v40, %v219_v44  ;;  %v243_v57 = vld [vmem:[#allocation2 + $0x41] ss:$2 sm:$0xf]  ;;  %v192_v59 = vmax.f32 %v180_v53, %v188_v55  ;;  %v221_v61 = vld [vmem:[#allocation2 + $0x52] ss:$2 sm:$0xf] }
  0x26   : > { %v214_v58 = vmax.f32 %v202_v51, %v209_v52  ;;  %v255_v62 = vld [vmem:[#allocation2 + $0x42] ss:$2 sm:$0xf]  ;;  %v211_v3 = vld [vmem:[#allocation2 + $0x71] ss:$2 sm:$0xf] }
  0x27   : > { %v264_v49 = vpack.c.bf16 %v260_v43, %v260_v43  ;;  %v237_v54 = vmax.f32 %v225_v46, %v231_v50  ;;  %v203_v0 = vmax.f32 %v192_v59, %v199_v56  ;;  %v233_v2 = vld [vmem:[#allocation2 + $0x60] ss:$2 sm:$0xf]  ;;  %v245_v5 = vld [vmem:[#allocation2 + $0x61] ss:$2 sm:$0xf] }
  0x28   : > { %v226_v63 = vmax.f32 %v214_v58, %v221_v61  ;;  %v223_v8 = vld [vmem:[#allocation2 + $0x72] ss:$2 sm:$0xf]  ;;  %v235_v9 = vld [vmem:[#allocation2 + $0x80] ss:$2 sm:$0xf] }
  0x29   : > { %269 = vst.msk [vmem:[%s460_s16] sm:$0x3] %vm268_vm2, %v264_v49  ;;  %v249_v60 = vmax.f32 %v237_v54, %v243_v57  ;;  %v215_v6 = vmax.f32 %v203_v0, %v211_v3  ;;  %v257_v12 = vld [vmem:[#allocation2 + $0x62] ss:$2 sm:$0xf] }
  0x2a   : > { %v238_v4 = vmax.f32 %v226_v63, %v233_v2  ;;  %v247_v15 = vld [vmem:[#allocation2 + $0x81] ss:$2 sm:$0xf]  ;;  %v259_v18 = vld [vmem:[#allocation2 + $0x82] ss:$2 sm:$0xf] }
  0x2b   : > { %v261_v1 = vmax.f32 %v249_v60, %v255_v62  ;;  %v227_v11 = vmax.f32 %v215_v6, %v223_v8 }
  0x2c   : > { %v250_v10 = vmax.f32 %v238_v4, %v245_v5 }
  0x2d   : > { %v265_v7 = vpack.c.bf16 %v261_v1, %v261_v1  ;;  %v239_v14 = vmax.f32 %v227_v11, %v235_v9 }
  0x2e   : > { %v262_v13 = vmax.f32 %v250_v10, %v257_v12 }
  0x2f   : > { %270 = vst.msk [vmem:[%s460_s16 + $0x2] sm:$0x3] %vm268_vm2, %v265_v7  ;;  %v251_v17 = vmax.f32 %v239_v14, %v247_v15 }
  0x30   : > { %v266_v16 = vpack.c.bf16 %v262_v13, %v262_v13 }
  0x31   : > { %v263_v19 = vmax.f32 %v251_v17, %v259_v18 }
  0x32   : > { %271 = vst.msk [vmem:[%s460_s16 + $0x4] sm:$0x3] %vm268_vm2, %v266_v16 }
  0x33   : > { %v267_v20 = vpack.c.bf16 %v263_v19, %v263_v19 }
  0x35   : > { %272 = vst.msk [vmem:[%s460_s16 + $0x6] sm:$0x3] %vm268_vm2, %v267_v20 }
  0x36 PF: > { %s11_s6 = sadd.s32 1, %s397_s6  }
  0x37   : > { %p8_p4 = scmp.ge.s32.totalorder %s11_s6, 4  }
  0x39   :  { %10 = sbr.rel (!%p8_p4) target bundleno = 1 (0x1), region = 89 }

// kernel: wsl_forward.2
= control target key start
LH: loop header
LB: loop body
LE: loop exit
PB: predicated region body
PF: predicated region fallthrough
CT: control target
= control target key end

     0   :  { %s629_s12 = smov 0   ;;  %s715_s0 = inlined_call_operand.vmem [shape: bf16[128,147], index: 0, kind: input, shape index: {}]   ;;  %s716_s1 = inlined_call_operand.vmem [shape: bf16[147,64], index: 1, kind: input, shape index: {}]   ;;  %s717_s2 = inlined_call_operand.vmem [shape: f32[1,64], index: 2, kind: input, shape index: {}]   ;;  %s718_s3 = inlined_call_operand.vmem [shape: bf16[128,64], index: 3, kind: output, shape index: {}]  }
   0x1 LB: > { %s495_s13 = sadd.s32 4294967295, %s605_s12   ;;  %p499_p0 = scmp.ge.s32.totalorder %s605_s12, 1  ;;  %s605_s12 = sphi %s629_s12, %s13_s12  }
   0x2   : > { %p139_p1 = scmp.lt.s32.totalorder %s605_s12, 3 }
   0x4   : > { %p140_p2 = pnand %p499_p0, %p139_p1 }
   0x5   : > { %v577_v0 = vld [vmem:[%s716_s1] sm:$0xff] (!%p140_p2)   ;;  %v607_v1 = vmov (!%p140_p2), 0   ;;  %v578_v2 = vld [vmem:[%s716_s1 + $0x8] sm:$0xff] (!%p140_p2)   ;;  %v579_v3 = vld [vmem:[%s716_s1 + $0x10] sm:$0xff] (!%p140_p2)   ;;  %s500_s20 = sshll.u32 (!%p140_p2), %s495_s13, 3  ;;  %vm305_vm0 = vcmask (!%p140_p2), 154624  }
   0x6   : > { %143 = sbr.rel (%p140_p2) target bundleno = 275 (0x113), region = 32  ;;  %325 = vmatprep.subr.bf16.mxu0 (!%p140_p2), %v607_v1  ;;  %547 = vmatprep.subr.bf16.mxu1 (!%p140_p2), %v607_v1  ;;  %p165_p3 = scmp.lt.s32.totalorder (!%p140_p2), %s500_s20, 15  ;;  %v580_v4 = vld [vmem:[%s716_s1 + $0x18] sm:$0xff] (!%p140_p2)   ;;  %v581_v5 = vld [vmem:[%s716_s1 + $0x20] sm:$0xff] (!%p140_p2)   ;;  %v582_v8 = vld [vmem:[%s716_s1 + $0x28] sm:$0xff] (!%p140_p2)   ;;  %vm318_vm1 = vcmask (!%p140_p2), 1040384  }
   0x7   : > { %326 = vmatpush1.bf16.msra.mxu0 (!%p140_p2), %v577_v0  ;;  %557 = vmatpush1.bf16.msra.mxu1 (!%p140_p2), %v577_v0  ;;  %v583_v9 = vld [vmem:[%s716_s1 + $0x30] sm:$0xff] (!%p140_p2)   ;;  %v584_v10 = vld [vmem:[%s716_s1 + $0x38] sm:$0xff] (!%p140_p2)   ;;  %vm319_vm2 = vcmask (!%p140_p2), 1041408   ;;  %v608_v11 = vmov (!%p140_p2), 65535   ;;  %v585_v13 = vld [vmem:[%s716_s1 + $0x40] sm:$0xff] (!%p140_p2)   ;;  %vm430_vm3 = vcmask (!%p140_p2), 519168  }
   0x8   : > { %327 = vmatprep.subr.bf16.mxu0 (!%p140_p2), %v607_v1  ;;  %548 = vmatprep.subr.bf16.mxu1 (!%p140_p2), %v607_v1  ;;  %v320_v12 = vsel (!%p140_p2), %vm318_vm1, 4294967295, %v608_v11  ;;  %v586_v14 = vld [vmem:[%s716_s1 + $0x48] ss:$0 sps:$4 sm:$0x33] (!%p140_p2)   ;;  %v505_v23 = vld [vmem:[%s717_s2] ss:$0 sm:$0xff] (!%p140_p2) }
   0x9   : > { %v321_v15 = vsel (!%p140_p2), %vm319_vm2, %v320_v12, 0 }
   0xa   : > { %v323_v16 = vand.u32 (!%p140_p2), %v586_v14, %v321_v15 }
   0xb   : > { %328 = vmatpush1.bf16.msra.mxu0 (!%p140_p2), %v578_v2  ;;  %558 = vmatpush1.bf16.msra.mxu1 (!%p140_p2), %v578_v2 }
   0xc   : > { %329 = vmatprep.subr.bf16.mxu0 (!%p140_p2), %v607_v1  ;;  %549 = vmatprep.subr.bf16.mxu1 (!%p140_p2), %v607_v1 }
   0xd   : > { %s720_s20 = smov (!%p165_p3, %s500_s20), 15 }
   0xe   : > { %s538_s23 = sshll.u32 %s720_s20, 3  ;;  %s504_s15 = sshll.u32 %s720_s20, 2 }
   0xf   : > { %330 = vmatpush1.bf16.msra.mxu0 %v579_v3  ;;  %559 = vmatpush1.bf16.msra.mxu1 %v579_v3  ;;  %s655_s26 = scalar_lea.vmem %s715_s0, %s538_s23  ;;  %s694_s18 = scalar_lea.vmem %s718_s3, %s504_s15 }
  0x10   : > { %331 = vmatprep.subr.bf16.mxu0 %v607_v1  ;;  %550 = vmatprep.subr.bf16.mxu1 %v607_v1  ;;  %v589_v6 = vld [vmem:[%s655_s26 + $0x4] ss:$8 sps:$4 sm:$0xff]   ;;  %v587_v17 = vld [vmem:[%s655_s26] ss:$8 sps:$4 sm:$0xff]   ;;  %v593_v19 = vld [vmem:[%s655_s26 + $0x14] ss:$8 sps:$4 sm:$0xff]  }
  0x11   : > { %v592_v7 = vld [vmem:[%s655_s26 + $0x24] ss:$8 sps:$4 sm:$0xff]   ;;  %524 = vmatprep.mubr.msk.bf16.mxu0 %vm305_vm0, %v589_v6  ;;  %v590_v18 = vld [vmem:[%s655_s26 + $0x20] ss:$8 sps:$4 sm:$0xff]   ;;  %v595_v20 = vld [vmem:[%s655_s26 + $0x34] ss:$8 sps:$4 sm:$0xff]  }
  0x12   : > { %526 = vmatprep.mubr.msk.bf16.mxu1 %vm305_vm0, %v592_v7  ;;  %v597_v21 = vld [vmem:[%s655_s26 + $0x10] ss:$8 sps:$4 sm:$0xff]  }
  0x13   : > { %332 = vmatpush1.bf16.msra.mxu0 %v580_v4  ;;  %560 = vmatpush1.bf16.msra.mxu1 %v580_v4  ;;  %v598_v22 = vld [vmem:[%s655_s26 + $0x30] ss:$8 sps:$4 sm:$0xff]  }
  0x14   : > { %333 = vmatprep.subr.bf16.mxu0 %v607_v1  ;;  %551 = vmatprep.subr.bf16.mxu1 %v607_v1 }
  0x17   : > { %334 = vmatpush1.bf16.msra.mxu0 %v581_v5  ;;  %561 = vmatpush1.bf16.msra.mxu1 %v581_v5 }
  0x18   : > { %335 = vmatprep.subr.bf16.mxu0 %v607_v1  ;;  %552 = vmatprep.subr.bf16.mxu1 %v607_v1 }
  0x1b   : > { %336 = vmatpush1.bf16.msra.mxu0 %v582_v8  ;;  %562 = vmatpush1.bf16.msra.mxu1 %v582_v8 }
  0x1c   : > { %337 = vmatprep.subr.bf16.mxu0 %v607_v1  ;;  %553 = vmatprep.subr.bf16.mxu1 %v607_v1 }
  0x1f   : > { %338 = vmatpush1.bf16.msra.mxu0 %v583_v9  ;;  %563 = vmatpush1.bf16.msra.mxu1 %v583_v9 }
  0x20   : > { %339 = vmatprep.subr.bf16.mxu0 %v607_v1  ;;  %554 = vmatprep.subr.bf16.mxu1 %v607_v1 }
  0x23   : > { %340 = vmatpush1.bf16.msra.mxu0 %v584_v10  ;;  %564 = vmatpush1.bf16.msra.mxu1 %v584_v10 }
  0x24   : > { %341 = vmatprep.subr.bf16.mxu0 %v607_v1  ;;  %555 = vmatprep.subr.bf16.mxu1 %v607_v1 }
  0x27   : > { %342 = vmatpush1.bf16.msra.mxu0 %v585_v13  ;;  %565 = vmatpush1.bf16.msra.mxu1 %v585_v13 }
  0x28   : > { %343 = vmatprep.subr.bf16.mxu0 %v607_v1  ;;  %556 = vmatprep.subr.bf16.mxu1 %v607_v1 }
  0x2b   : > { %344 = vmatpush1.bf16.msra.mxu0 %v323_v16  ;;  %566 = vmatpush1.bf16.msra.mxu1 %v323_v16 }
  0x2e   : > { %358 = vmatmul.mubr.bf16.vlgmr.msra.gmra.mrb[0].mxu0 %v587_v17  ;;  %374 = vmatmul.mubr.bf16.vlgmr.msra.gmra.mrb[0].mxu1 %v590_v18 }
  0x2f   : > { %525 = vmatprep.mubr.msk.bf16.mxu0 %vm305_vm0, %v593_v19  ;;  %527 = vmatprep.mubr.msk.bf16.mxu1 %vm305_vm0, %v595_v20 }
  0x36   : > { %366 = vmatmul.mubr.bf16.gmra.mrb[4].mxu0 %v597_v21  ;;  %382 = vmatmul.mubr.bf16.gmra.mrb[4].mxu1 %v598_v22 }
 0x101   : > { %v359_v24 = vpop.f32.mrb[0].mxu0  ;;  %v375_v25 = vpop.f32.mrb[0].mxu1 }
 0x102   : > { %v360_v26 = vadd.f32 %v505_v23, %v359_v24  ;;  %v376_v27 = vadd.f32 %v505_v23, %v375_v25  ;;  %v361_v28 = vpop.f32.mrb[1].mxu0  ;;  %v377_v29 = vpop.f32.mrb[1].mxu1 }
 0x103   : > { %v362_v30 = vpop.f32.mrb[2].mxu0  ;;  %v378_v31 = vpop.f32.mrb[2].mxu1 }
 0x104   : > { %v390_v32 = vmax.f32 %v360_v26, 0.0  ;;  %v394_v33 = vmax.f32 %v376_v27, 0.0  ;;  %v363_v34 = vadd.f32 %v505_v23, %v362_v30  ;;  %v379_v35 = vadd.f32 %v505_v23, %v378_v31  ;;  %v364_v36 = vpop.f32.mrb[3].mxu0  ;;  %v380_v37 = vpop.f32.mrb[3].mxu1 }
 0x106   : > { %v539_v38 = vpack.c.bf16 %v390_v32, %v390_v32  ;;  %v543_v39 = vpack.c.bf16 %v394_v33, %v394_v33  ;;  %v391_v40 = vmax.f32 %v363_v34, 0.0  ;;  %v395_v41 = vmax.f32 %v379_v35, 0.0 }
 0x108   : > { %431 = vst.msk [vmem:[%s694_s18] sm:$0xf] %vm430_vm3, %v539_v38  ;;  %435 = vst.msk [vmem:[%s694_s18 + $0x10] sm:$0xf] %vm430_vm3, %v543_v39  ;;  %v540_v42 = vpack.c.bf16 %v391_v40, %v391_v40  ;;  %v544_v43 = vpack.c.bf16 %v395_v41, %v395_v41 }
 0x109   : > { %v367_v44 = vpop.f32.mrb[4].mxu0  ;;  %v383_v45 = vpop.f32.mrb[4].mxu1 }
 0x10a   : > { %432 = vst.msk [vmem:[%s694_s18 + $0x4] sm:$0xf] %vm430_vm3, %v540_v42  ;;  %436 = vst.msk [vmem:[%s694_s18 + $0x14] sm:$0xf] %vm430_vm3, %v544_v43  ;;  %v368_v46 = vadd.f32 %v505_v23, %v367_v44  ;;  %v384_v47 = vadd.f32 %v505_v23, %v383_v45  ;;  %v369_v48 = vpop.f32.mrb[5].mxu0  ;;  %v385_v49 = vpop.f32.mrb[5].mxu1 }
 0x10b   : > { %v370_v50 = vpop.f32.mrb[6].mxu0  ;;  %v386_v51 = vpop.f32.mrb[6].mxu1 }
 0x10c   : > { %v392_v52 = vmax.f32 %v368_v46, 0.0  ;;  %v396_v53 = vmax.f32 %v384_v47, 0.0  ;;  %v371_v54 = vadd.f32 %v505_v23, %v370_v50  ;;  %v387_v55 = vadd.f32 %v505_v23, %v386_v51  ;;  %v372_v56 = vpop.f32.mrb[7].mxu0  ;;  %v388_v57 = vpop.f32.mrb[7].mxu1 }
 0x10e   : > { %v541_v58 = vpack.c.bf16 %v392_v52, %v392_v52  ;;  %v545_v59 = vpack.c.bf16 %v396_v53, %v396_v53  ;;  %v393_v60 = vmax.f32 %v371_v54, 0.0  ;;  %v397_v61 = vmax.f32 %v387_v55, 0.0 }
 0x110   : > { %433 = vst.msk [vmem:[%s694_s18 + $0x8] sm:$0xf] %vm430_vm3, %v541_v58  ;;  %437 = vst.msk [vmem:[%s694_s18 + $0x18] sm:$0xf] %vm430_vm3, %v545_v59  ;;  %v542_v62 = vpack.c.bf16 %v393_v60, %v393_v60  ;;  %v546_v63 = vpack.c.bf16 %v397_v61, %v397_v61 }
 0x112   : > { %434 = vst.msk [vmem:[%s694_s18 + $0xc] sm:$0xf] %vm430_vm3, %v542_v62  ;;  %438 = vst.msk [vmem:[%s694_s18 + $0x1c] sm:$0xf] %vm430_vm3, %v546_v63 }
 0x113 PF: > { %s13_s12 = sadd.s32 1, %s605_s12  }
 0x114   : > { %p10_p4 = scmp.ge.s32.totalorder %s13_s12, 4  }
 0x116   :  { %12 = sbr.rel (!%p10_p4) target bundleno = 1 (0x1), region = 62 }

</bundles_post_ra>
